<compile_context>
chip_gen: v7x
topology: tpu7x:2x2x1
jax: 0.10.0
libtpu: 0.0.40
codegen_flags: <defaults>
</compile_context>

<pallas_src>
import functools
import math

import jax
import jax.numpy as jnp
import numpy as np
from jax.experimental import pallas as pl
from jax.experimental.pallas import tpu as pltpu


def _adaptive_mask_kernel(mask_ref, x_ref, o_ref):
    """Broadcast-multiply one lane-dense tile by the precomputed mask row.

    mask_ref : VMEM (1, W)          float32   finished mask, tiled to width W
    x_ref    : VMEM (block_rows, W) x.dtype   input tile
    o_ref    : VMEM (block_rows, W) x.dtype   output tile
    """
    x = x_ref[...]
    m = mask_ref[...]
    # Compute in f32 (safe on v5e which lacks a bf16 VALU); HBM traffic stays
    # in the native dtype.  Mem-bound kernel -> the cast is free filler.
    o_ref[...] = (x.astype(jnp.float32) * m).astype(o_ref.dtype)


@functools.partial(jax.jit,
                   static_argnames=("max_size", "ramp_size",
                                    "target_block_bytes"))
def adaptive_mask_forward(x, current_val, mask_template, *, max_size,
                          ramp_size, target_block_bytes=4 * 1024 * 1024):
    """Apply AdaptiveMask.forward to x (any shape, last dim L <= max_size)."""
    orig_shape = x.shape
    dtype = x.dtype
    L = int(orig_shape[-1])
    assert L <= max_size, "last dim must not exceed max_size"
    # TODO(synk): only the default scalar `shape=(1,)` current_val is handled;
    # per-head current_val (e.g. shape (n_heads,1,1)) would need a per-head
    # (H, L) mask and a per-head fold.
    assert int(np.prod(current_val.shape)) == 1, \
        "only scalar current_val (shape=(1,)) is supported"

    # ---- Build the finished (L,) mask row in the wrapper (tiny, O(L)). ----
    cv = jnp.reshape(current_val, (-1,))[0].astype(jnp.float32)
    tmpl = mask_template[-L:].astype(jnp.float32)          # mask[..., -L:]
    mask_row = tmpl + cv * jnp.float32(max_size)
    mask_row = mask_row / jnp.float32(ramp_size) + jnp.float32(1.0)
    mask_row = jnp.clip(mask_row, 0.0, 1.0)                # (L,) f32

    # ---- Lane-dense folding: pack G rows of length L into W = G*L. ----
    total = int(np.prod(orig_shape))
    R = total // L                                         # number of L-rows
    itemsize = jnp.dtype(dtype).itemsize

    G = 128 // math.gcd(L, 128)                            # lcm(L,128) // L
    W = G * L                                              # multiple of 128
    # Only drop the fold if W is so wide that blocks fall below 8 sublanes.
    if target_block_bytes // (W * itemsize) < 8:
        G, W = 1, L                                        # W == full last dim

    # Pad R only up to a multiple of G (needed for the contiguous
    # (R, L) -> (Rf, W) reshape).  No pad / no output slice when R % G == 0.
    R_pad = -(-R // G) * G
    x2 = jnp.reshape(x, (R, L))
    if R_pad != R:
        x2 = jnp.pad(x2, ((0, R_pad - R), (0, 0)))
    Rf = R_pad // G
    xf = jnp.reshape(x2, (Rf, W))                          # contiguous, free

    mask_tile = jnp.tile(jnp.reshape(mask_row, (1, L)), (1, G))  # (1, W) f32

    # ---- Block sizing: MiB-scale blocks, ragged last block allowed. ----
    if Rf <= 8:
        block_rows = Rf                                    # == full dim: ok
    else:
        block_rows = int(target_block_bytes // (W * itemsize))
        block_rows = max(8, (block_rows // 8) * 8)
        # Keep >= ~4 grid steps so double-buffering overlaps DMA with compute.
        quarter = (-(-Rf // 4) + 7) // 8 * 8               # round_up(cdiv,8)
        block_rows = min(block_rows, quarter)
    n_blocks = -(-Rf // block_rows)

    out = pl.pallas_call(
        _adaptive_mask_kernel,
        out_shape=jax.ShapeDtypeStruct((Rf, W), dtype),
        grid_spec=pltpu.PrefetchScalarGridSpec(
            num_scalar_prefetch=0,
            grid=(n_blocks,),
            in_specs=[
                pl.BlockSpec((1, W), lambda i: (0, 0)),            # mask row
                pl.BlockSpec((block_rows, W), lambda i: (i, 0)),   # x tile
            ],
            out_specs=pl.BlockSpec((block_rows, W), lambda i: (i, 0)),
        ),
        compiler_params=pltpu.CompilerParams(
            dimension_semantics=("parallel",),
            vmem_limit_bytes=48 * 1024 * 1024,   # > scoped default; safe on
        ),                                        # v5e/v6e (128 MiB) & v7x (64)
    )(mask_tile, xf)

    out = jnp.reshape(out, (R_pad, L))
    if R_pad != R:
        out = out[:R]
    return jnp.reshape(out, orig_shape)


def _reference(x, current_val, mask_template, max_size, ramp_size):
    L = x.shape[-1]
    mask = mask_template[-L:] + jnp.reshape(current_val, (-1,))[0] * max_size
    mask = mask / ramp_size + 1.0
    mask = jnp.clip(mask, 0.0, 1.0)
    return (x.astype(jnp.float32) * mask).astype(x.dtype)


if __name__ == "__main__":
    # Module hyper-params (deterministic, in-script).
    MAX_SIZE = 16
    RAMP_SIZE = 4
    INIT_VAL = 0.5
    PARAM_SHAPE = (1,)

    # Parameters / buffers exactly as in __init__.
    current_val = jnp.zeros(PARAM_SHAPE, jnp.float32) + INIT_VAL
    mask_template = jnp.linspace(1 - MAX_SIZE, 0, MAX_SIZE, dtype=jnp.float32)

    key = jax.random.PRNGKey(0)
    k0, k1, k2, k3 = jax.random.split(key, 4)

    # Test 1: attention-like f32 tensor (B, H, Q, L) with L == max_size.
    x = jax.random.normal(k0, (2, 4, 16, 16), dtype=jnp.float32)
    y = adaptive_mask_forward(x, current_val, mask_template,
                              max_size=MAX_SIZE, ramp_size=RAMP_SIZE)
    y = jax.block_until_ready(y)
    ref = _reference(x, current_val, mask_template, MAX_SIZE, RAMP_SIZE)
    np.testing.assert_allclose(np.asarray(y), np.asarray(ref),
                               rtol=1e-6, atol=1e-6)

    # Test 2: bf16 input, odd row count, L < max_size (exercises G-padding,
    # template slicing, native-dtype output path).
    xb = jax.random.normal(k1, (3, 5, 8), dtype=jnp.float32).astype(jnp.bfloat16)
    yb = adaptive_mask_forward(xb, current_val, mask_template,
                               max_size=MAX_SIZE, ramp_size=RAMP_SIZE)
    yb = jax.block_until_ready(yb)
    refb = _reference(xb, current_val, mask_template, MAX_SIZE, RAMP_SIZE)
    np.testing.assert_allclose(np.asarray(yb, dtype=np.float32),
                               np.asarray(refb, dtype=np.float32),
                               rtol=1e-2, atol=1e-2)

    # Test 3: ragged last grid block (Rf not a multiple of block_rows).
    xc = jax.random.normal(k2, (5, 3, 16, 16), dtype=jnp.float32)
    yc = adaptive_mask_forward(xc, current_val, mask_template,
                               max_size=MAX_SIZE, ramp_size=RAMP_SIZE)
    yc = jax.block_until_ready(yc)
    refc = _reference(xc, current_val, mask_template, MAX_SIZE, RAMP_SIZE)
    np.testing.assert_allclose(np.asarray(yc), np.asarray(refc),
                               rtol=1e-6, atol=1e-6)

    # Test 4: odd last dim (L=7) — exercises the kept lane-dense fold (W=896).
    xd = jax.random.normal(k3, (4, 6, 7), dtype=jnp.float32)
    yd = adaptive_mask_forward(xd, current_val, mask_template,
                               max_size=MAX_SIZE, ramp_size=RAMP_SIZE)
    yd = jax.block_until_ready(yd)
    refd = _reference(xd, current_val, mask_template, MAX_SIZE, RAMP_SIZE)
    np.testing.assert_allclose(np.asarray(yd), np.asarray(refd),
                               rtol=1e-6, atol=1e-6)

    print("KERNEL_OK")
</pallas_src>

<mosaic_0001>
module attributes {stable_mosaic.version = 11 : i64} {
  func.func @_adaptive_mask_kernel(%arg0: i32, %arg1: memref<1x128xf32, #tpu.memory_space<vmem>>, %arg2: memref<8x128xf32, #tpu.memory_space<vmem>>, %arg3: memref<8x128xf32, #tpu.memory_space<vmem>>) attributes {dimension_semantics = [#tpu.dimension_semantics<parallel>], iteration_bounds = array<i64: 2>, scalar_prefetch = 0 : i64, scratch_operands = 0 : i64, tpu.core_type = #tpu.core_type<tc>, window_params = [{pipeline_mode = #tpu.pipeline_mode<synchronous>, transform_indices = @transform_0, window_bounds = array<i64: 1, 128>}, {transform_indices = @transform_1, window_bounds = array<i64: 8, 128>}, {transform_indices = @transform_2, window_bounds = array<i64: 8, 128>}]} {
    %c0 = arith.constant 0 : index
    %c0_0 = arith.constant 0 : index
    %0 = vector.load %arg2[%c0, %c0_0] : memref<8x128xf32, #tpu.memory_space<vmem>>, vector<8x128xf32>
    %c0_1 = arith.constant 0 : index
    %c0_2 = arith.constant 0 : index
    %1 = vector.load %arg1[%c0_1, %c0_2] : memref<1x128xf32, #tpu.memory_space<vmem>>, vector<1x128xf32>
    %2 = vector.broadcast %1 : vector<1x128xf32> to vector<8x128xf32>
    %3 = arith.mulf %0, %2 : vector<8x128xf32>
    %c0_3 = arith.constant 0 : index
    %c0_4 = arith.constant 0 : index
    %4 = vector.load %arg3[%c0_3, %c0_4] : memref<8x128xf32, #tpu.memory_space<vmem>>, vector<8x128xf32>
    tpu.vector_store %arg3[%c0_3, %c0_4], %3 {strides = array<i32>} : memref<8x128xf32, #tpu.memory_space<vmem>>, vector<8x128xf32>,
    return
  }
  func.func @transform_0(%arg0: i32) -> (i32, i32) {
    %c0_i32 = arith.constant 0 : i32
    %c0_i32_0 = arith.constant 0 : i32
    %c0_i32_1 = arith.constant 0 : i32
    return %c0_i32, %c0_i32_0 : i32, i32
  }
  func.func @transform_1(%arg0: i32) -> (i32, i32) {
    %c0_i32 = arith.constant 0 : i32
    %c0_i32_0 = arith.constant 0 : i32
    return %arg0, %c0_i32 : i32, i32
  }
  func.func @transform_2(%arg0: i32) -> (i32, i32) {
    %c0_i32 = arith.constant 0 : i32
    %c0_i32_0 = arith.constant 0 : i32
    return %arg0, %c0_i32 : i32, i32
  }
}

</mosaic_0001>

<bundles_post_ra>
// kernel: adaptive_mask_forward.1
= control target key start
LH: loop header
LB: loop body
LE: loop exit
PB: predicated region body
PF: predicated region fallthrough
CT: control target
= control target key end

     0   :  { %s224_s9 = smov 0   ;;  %s252_s0 = inlined_call_operand.vmem [shape: f32[1,128], index: 0, kind: input, shape index: {}]   ;;  %s253_s1 = inlined_call_operand.vmem [shape: f32[16,128], index: 1, kind: input, shape index: {}]   ;;  %s254_s2 = inlined_call_operand.vmem [shape: f32[16,128], index: 2, kind: output, shape index: {}]  }
   0x1 LB: > { %s202_s10 = sadd.s32 4294967295, %s226_s9   ;;  %p206_p0 = scmp.ge.s32.totalorder %s226_s9, 1  ;;  %s226_s9 = sphi %s224_s9, %s12_s9  }
   0x2   : > { %p111_p1 = scmp.lt.s32.totalorder %s226_s9, 3 }
   0x4   : > { %p112_p2 = pnand %p206_p0, %p111_p1 }
   0x5   : > { %p131_p3 = scmp.lt.s32.totalorder (!%p112_p2), %s202_s10, 1  ;;  %v209_v0 = vld [vmem:[%s252_s0] ss:$0 sm:$0xff] (!%p112_p2) }
   0x6   : > { %115 = sbr.rel (%p112_p2) target bundleno = 20 (0x14), region = 28 }
   0xd   : > { %s256_s10 = smov (!%p131_p3, %s202_s10), 1 }
   0xe   : > { %s207_s11 = sshll.u32 %s256_s10, 3 }
   0xf   : > { %s134_s16 = scalar_lea.vmem %s253_s1, %s207_s11  ;;  %s138_s19 = scalar_lea.vmem %s254_s2, %s207_s11 }
  0x10   : > { %v139_v1 = vld [vmem:[%s134_s16] sm:$0xff] }
  0x11   : > { %v147_v2 = vmul.f32 %v209_v0, %v139_v1 }
  0x13   : > { %148 = vst [vmem:[%s138_s19] sm:$0xff] %v147_v2 }
  0x14 PF: > { %s12_s9 = sadd.s32 1, %s226_s9  }
  0x15   : > { %p9_p4 = scmp.ge.s32.totalorder %s12_s9, 4  }
  0x17   :  { %11 = sbr.rel (!%p9_p4) target bundleno = 1 (0x1), region = 58 }

</bundles_post_ra>
